<compile_context>
chip_gen: v5e
topology: v5e:2x2
jax: 0.10.0
libtpu: 0.0.40
codegen_flags: <defaults>
</compile_context>

<pallas_src>
import functools

import jax
import jax.numpy as jnp
from jax.experimental import pallas as pl
from jax.experimental.pallas import tpu as pltpu

_MIB = 1024 * 1024


def _round_up(x, m):
    return ((x + m - 1) // m) * m


def _cdiv(a, b):
    return -(-a // b)


# --------------------------------------------------------------------------- #
# Kernels
# --------------------------------------------------------------------------- #
def _conv_bn_relu_nk1_kernel(p_ref, w_ref, b_ref, o_ref):
    """nk == 1 (weight resident): single matmul + shift + ReLU, no scratch.

    p_ref : (tm, tk)        bf16 patch tile
    w_ref : (tk, Cout_pad)  bf16 conv weight with BN scale pre-folded
    b_ref : (1, Cout_pad)   f32 folded BN shift = beta - mean * scale
    o_ref : (tm, Cout_pad)  output tile
    """
    y = jnp.dot(p_ref[...], w_ref[...], preferred_element_type=jnp.float32)
    o_ref[...] = jnp.maximum(y + b_ref[...], 0.0).astype(o_ref.dtype)


def _conv_bn_relu_acc_kernel(p_ref, w_ref, b_ref, o_ref, acc_ref):
    """nk > 1 fallback: f32 VMEM accumulator across the (inner, 'arbitrary') K axis."""
    k = pl.program_id(1)

    @pl.when(k == 0)
    def _init():
        acc_ref[...] = jnp.zeros_like(acc_ref)

    acc_ref[...] += jnp.dot(p_ref[...], w_ref[...],
                            preferred_element_type=jnp.float32)

    @pl.when(k == pl.num_programs(1) - 1)
    def _finalize():
        o_ref[...] = jnp.maximum(acc_ref[...] + b_ref[...],
                                 0.0).astype(o_ref.dtype)


# --------------------------------------------------------------------------- #
# Tiling / hardware heuristics
# --------------------------------------------------------------------------- #
def _tpu_vmem_capacity_bytes():
    try:
        info = pltpu.get_tpu_info()
        cap = getattr(info, "vmem_capacity_bytes", None)
        if cap:
            return int(cap)
    except Exception:
        pass
    return 64 * _MIB  # conservative default (v7x per-TC)


def _pick_tiles(m, kfeat, cout, in_bytes, out_bytes, vmem_budget_bytes,
                want_multi_mtiles):
    """Returns (tm, tk, nm, nk, m_pad, kfeat_pad, cout_pad, vmem_need_bytes)."""
    cout_pad = _round_up(cout, 128)
    kfeat_128 = _round_up(kfeat, 128)

    # Resident weight: nk == 1 whenever the whole padded weight tile fits a cap.
    # With a constant weight block index, Pallas fetches it once and keeps it
    # in VMEM across all M tiles (no per-M-tile re-streaming from HBM).
    weight_cap = min(8 * _MIB, vmem_budget_bytes // 3)
    if kfeat_128 * cout_pad * in_bytes <= weight_cap:
        nk, tk = 1, kfeat_128
    else:
        # Minimal K padding: pick the number of K tiles first, then size tk.
        nk = _cdiv(kfeat, 1024)
        tk = _round_up(_cdiv(kfeat, nk), 128)
        nk = _cdiv(kfeat, tk)
    kfeat_pad = nk * tk

    acc_bytes = 0 if nk == 1 else 4
    tm = 128
    for cand in (1024, 512, 256, 128):
        need = (2 * cand * tk * in_bytes            # patch tile, double-buffered
                + 2 * tk * cout_pad * in_bytes      # weight tile, double-buffered
                + 2 * cand * cout_pad * out_bytes   # output tile, double-buffered
                + cand * cout_pad * acc_bytes)      # f32 accumulator (nk > 1 only)
        if need <= vmem_budget_bytes:
            tm = cand
            break

    # Keep >= 2 M tiles only on multi-TensorCore parts (v7x) so both cores get
    # work; on single-TC v5e/v6e splitting small M only adds per-step overhead.
    if want_multi_mtiles:
        while tm > 128 and _cdiv(m, tm) < 2:
            tm //= 2

    # Never tile past the (8-row-padded) problem size.
    tm = min(tm, _round_up(m, 8))
    m_pad = _round_up(m, tm)
    nm = m_pad // tm

    vmem_need = (2 * tm * tk * in_bytes
                 + 2 * tk * cout_pad * in_bytes
                 + 2 * tm * cout_pad * out_bytes
                 + tm * cout_pad * acc_bytes
                 + 4 * cout_pad * 4)
    return tm, tk, nm, nk, m_pad, kfeat_pad, cout_pad, vmem_need


# --------------------------------------------------------------------------- #
# im2col glue (not the hot path)
# --------------------------------------------------------------------------- #
def _im2col_nhwc(x_nhwc, kh, kw, stride, padding, kfeat_pad):
    """Extract conv patches, folding the K-dim zero padding into the concat.

    Returns (N, H_out, W_out, kfeat_pad) with feature ordering (kh, kw, cin),
    matching a weight reshaped from torch (Cout, Cin, Kh, Kw) -> (Kh, Kw, Cin, Cout).
    """
    n, h, w, cin = x_nhwc.shape
    h_out = (h + 2 * padding - kh) // stride + 1
    w_out = (w + 2 * padding - kw) // stride + 1
    x_pad = x_nhwc
    if padding:
        x_pad = jnp.pad(
            x_nhwc, ((0, 0), (padding, padding), (padding, padding), (0, 0)))
    pieces = []
    for i in range(kh):
        for j in range(kw):
            pieces.append(x_pad[:, i:i + (h_out - 1) * stride + 1:stride,
                                j:j + (w_out - 1) * stride + 1:stride, :])
    kfeat = kh * kw * cin
    if kfeat_pad > kfeat:
        pieces.append(jnp.zeros((n, h_out, w_out, kfeat_pad - kfeat),
                                x_nhwc.dtype))
    return jnp.concatenate(pieces, axis=-1), h_out, w_out


# --------------------------------------------------------------------------- #
# Forward pass
# --------------------------------------------------------------------------- #
@functools.partial(jax.jit,
                   static_argnames=("stride", "padding", "groups",
                                    "compute_dtype", "out_dtype"))
def conv_layer_forward(x_nchw, weight, gamma, beta, running_mean, running_var,
                       *, stride=1, padding=0, groups=1, eps=1e-5,
                       compute_dtype=jnp.bfloat16, out_dtype=jnp.float32):
    """ConvLayer forward: conv2d(bias=False) -> BatchNorm(eval) -> ReLU.

    x_nchw : (N, Cin, H, W)        -- PyTorch layout
    weight : (Cout, Cin, Kh, Kw)   -- PyTorch conv weight layout
    Set out_dtype=jnp.bfloat16 when the consumer is another ConvLayer to halve
    output HBM writeback (accumulation stays f32 either way).
    """
    assert groups == 1  # TODO(synk): grouped/depthwise conv (LightConv3x3) not implemented in this kernel.

    n, cin, h, w = x_nchw.shape
    cout, cin_w, kh, kw = weight.shape
    assert cin_w == cin

    # ---- eval-mode BN fold: scale into the f32 weight, only shift remains ----
    scale = gamma.astype(jnp.float32) / jnp.sqrt(
        running_var.astype(jnp.float32) + eps)
    shift = beta.astype(jnp.float32) - running_mean.astype(jnp.float32) * scale

    # torch weight (Cout, Cin, Kh, Kw) -> (Kh, Kw, Cin, Cout) -> (Kfeat, Cout)
    kfeat = kh * kw * cin
    w_mat = jnp.transpose(weight, (2, 3, 1, 0)).reshape(kfeat, cout)
    w_mat = (w_mat.astype(jnp.float32) * scale[None, :]).astype(compute_dtype)

    h_out = (h + 2 * padding - kh) // stride + 1
    w_out = (w + 2 * padding - kw) // stride + 1
    m = n * h_out * w_out

    # ---- generation-aware tiling -------------------------------------------
    in_bytes = jnp.dtype(compute_dtype).itemsize
    out_bytes = jnp.dtype(out_dtype).itemsize
    vmem_cap = _tpu_vmem_capacity_bytes()
    multi_tc = vmem_cap <= 96 * _MIB           # v7x: 64 MiB/TC, 2 TCs/chip
    budget = 24 * _MIB if multi_tc else 48 * _MIB

    tm, tk, nm, nk, m_pad, kfeat_pad, cout_pad, vmem_need = _pick_tiles(
        m, kfeat, cout, in_bytes, out_bytes, budget, multi_tc)

    # ---- glue: bf16 cast before transpose; patches with K-pad folded in -----
    x_nhwc = jnp.transpose(x_nchw.astype(compute_dtype), (0, 2, 3, 1))
    if kh == 1 and kw == 1 and padding == 0:
        # 1x1 fast path: no im2col materialization at all.
        patches = x_nhwc[:, ::stride, ::stride, :].reshape(m, kfeat)
        if kfeat_pad > kfeat:
            patches = jnp.pad(patches, ((0, 0), (0, kfeat_pad - kfeat)))
    else:
        patches, _, _ = _im2col_nhwc(x_nhwc, kh, kw, stride, padding, kfeat_pad)
        patches = patches.reshape(m, kfeat_pad)
    if m_pad > m:
        patches = jnp.pad(patches, ((0, m_pad - m), (0, 0)))

    w_mat = jnp.pad(w_mat, ((0, kfeat_pad - kfeat), (0, cout_pad - cout)))
    shift_row = jnp.pad(shift, (0, cout_pad - cout)).reshape(1, cout_pad)

    # vmem limit derived from the actual per-step need (+ headroom), capped to HW.
    vmem_limit = max(int(vmem_need) + 8 * _MIB, 16 * _MIB)
    vmem_limit = min(vmem_limit, max(vmem_cap - 4 * _MIB, 16 * _MIB))

    # ---- Pallas hot path -----------------------------------------------------
    if nk == 1:
        out_flat = pl.pallas_call(
            _conv_bn_relu_nk1_kernel,
            out_shape=jax.ShapeDtypeStruct((m_pad, cout_pad), out_dtype),
            grid_spec=pltpu.PrefetchScalarGridSpec(
                num_scalar_prefetch=0,
                grid=(nm,),
                in_specs=[
                    pl.BlockSpec((tm, tk), lambda i: (i, 0)),
                    pl.BlockSpec((tk, cout_pad), lambda i: (0, 0)),   # resident
                    pl.BlockSpec((1, cout_pad), lambda i: (0, 0)),
                ],
                out_specs=pl.BlockSpec((tm, cout_pad), lambda i: (i, 0)),
            ),
            compiler_params=pltpu.CompilerParams(
                dimension_semantics=("parallel",),
                vmem_limit_bytes=int(vmem_limit),
            ),
        )(patches, w_mat, shift_row)
    else:
        out_flat = pl.pallas_call(
            _conv_bn_relu_acc_kernel,
            out_shape=jax.ShapeDtypeStruct((m_pad, cout_pad), out_dtype),
            grid_spec=pltpu.PrefetchScalarGridSpec(
                num_scalar_prefetch=0,
                grid=(nm, nk),
                in_specs=[
                    pl.BlockSpec((tm, tk), lambda i, k: (i, k)),
                    pl.BlockSpec((tk, cout_pad), lambda i, k: (k, 0)),
                    pl.BlockSpec((1, cout_pad), lambda i, k: (0, 0)),
                ],
                out_specs=pl.BlockSpec((tm, cout_pad), lambda i, k: (i, 0)),
                scratch_shapes=[pltpu.VMEM((tm, cout_pad), jnp.float32)],
            ),
            compiler_params=pltpu.CompilerParams(
                dimension_semantics=("parallel", "arbitrary"),
                vmem_limit_bytes=int(vmem_limit),
            ),
        )(patches, w_mat, shift_row)

    out = out_flat[:m, :cout].reshape(n, h_out, w_out, cout)
    # back to PyTorch NCHW
    return jnp.transpose(out, (0, 3, 1, 2)).astype(out_dtype)


# --------------------------------------------------------------------------- #
# Pure-JAX reference + self-test
# --------------------------------------------------------------------------- #
def _reference(x_nchw, weight, gamma, beta, mean, var, *, stride, padding,
               eps=1e-5, compute_dtype=jnp.bfloat16):
    """Reference: bf16-operand conv (f32 accumulation) + f32 BN(eval) + ReLU."""
    y = jax.lax.conv_general_dilated(
        x_nchw.astype(compute_dtype), weight.astype(compute_dtype),
        window_strides=(stride, stride),
        padding=[(padding, padding), (padding, padding)],
        dimension_numbers=("NCHW", "OIHW", "NCHW"),
        preferred_element_type=jnp.float32)
    scale = (gamma / jnp.sqrt(var + eps)).reshape(1, -1, 1, 1)
    shift = (beta - mean * (gamma / jnp.sqrt(var + eps))).reshape(1, -1, 1, 1)
    return jnp.maximum(y * scale + shift, 0.0)


if __name__ == "__main__":
    # ConvLayer(in_channels=4, out_channels=8, kernel_size=3, bn_norm='BN',
    #           stride=1, padding=1)
    N, Cin, H, W = 2, 4, 16, 16
    Cout, K = 8, 3
    stride, padding = 1, 1

    key = jax.random.PRNGKey(0)
    kx, kw, km, kv = jax.random.split(key, 4)

    x = jax.random.normal(kx, (N, Cin, H, W), dtype=jnp.float32)
    conv_w = jax.random.normal(kw, (Cout, Cin, K, K), dtype=jnp.float32) * 0.1

    # BatchNorm params: __init__ sets weight=1, bias=0; non-trivial running
    # stats so the eval-mode BN math is actually exercised.
    gamma = jnp.ones((Cout,), jnp.float32)
    beta = jnp.zeros((Cout,), jnp.float32)
    running_mean = jax.random.normal(km, (Cout,), dtype=jnp.float32) * 0.1
    running_var = jnp.abs(jax.random.normal(kv, (Cout,), dtype=jnp.float32)) + 0.5

    out = conv_layer_forward(x, conv_w, gamma, beta, running_mean, running_var,
                             stride=stride, padding=padding, groups=1)
    out = jax.block_until_ready(out)

    ref = _reference(x, conv_w, gamma, beta, running_mean, running_var,
                     stride=stride, padding=padding)
    assert out.shape == (N, Cout, H, W), out.shape
    # bf16 operands + f32 accumulation in both; kernel folds BN scale into the
    # weight pre-quantization, so allow a small extra bf16 tolerance.
    assert jnp.allclose(out, ref, rtol=2e-2, atol=2e-2), (
        float(jnp.max(jnp.abs(out - ref))))

    # Also exercise the 1x1 fast path once (Conv1x1-style layer).
    conv_w1 = jax.random.normal(kw, (Cout, Cin, 1, 1), dtype=jnp.float32) * 0.1
    out1 = conv_layer_forward(x, conv_w1, gamma, beta, running_mean,
                              running_var, stride=1, padding=0, groups=1)
    out1 = jax.block_until_ready(out1)
    ref1 = _reference(x, conv_w1, gamma, beta, running_mean, running_var,
                      stride=1, padding=0)
    assert out1.shape == (N, Cout, H, W), out1.shape
    assert jnp.allclose(out1, ref1, rtol=2e-2, atol=2e-2), (
        float(jnp.max(jnp.abs(out1 - ref1))))

    print("KERNEL_OK")
</pallas_src>

<mosaic_0001>
module attributes {stable_mosaic.version = 11 : i64} {
  func.func @_conv_bn_relu_nk1_kernel(%arg0: i32, %arg1: memref<256x128xbf16, #tpu.memory_space<vmem>>, %arg2: memref<128x128xbf16, #tpu.memory_space<vmem>>, %arg3: memref<1x128xf32, #tpu.memory_space<vmem>>, %arg4: memref<256x128xf32, #tpu.memory_space<vmem>>) attributes {dimension_semantics = [#tpu.dimension_semantics<parallel>], iteration_bounds = array<i64: 2>, scalar_prefetch = 0 : i64, scratch_operands = 0 : i64, tpu.core_type = #tpu.core_type<tc>, window_params = [{transform_indices = @transform_0, window_bounds = array<i64: 256, 128>}, {pipeline_mode = #tpu.pipeline_mode<synchronous>, transform_indices = @transform_1, window_bounds = array<i64: 128, 128>}, {pipeline_mode = #tpu.pipeline_mode<synchronous>, transform_indices = @transform_2, window_bounds = array<i64: 1, 128>}, {transform_indices = @transform_3, window_bounds = array<i64: 256, 128>}]} {
    %c0 = arith.constant 0 : index
    %c0_0 = arith.constant 0 : index
    %0 = vector.load %arg1[%c0, %c0_0] : memref<256x128xbf16, #tpu.memory_space<vmem>>, vector<256x128xbf16>
    %c0_1 = arith.constant 0 : index
    %c0_2 = arith.constant 0 : index
    %1 = vector.load %arg2[%c0_1, %c0_2] : memref<128x128xbf16, #tpu.memory_space<vmem>>, vector<128x128xbf16>
    %cst = arith.constant dense<0.000000e+00> : vector<256x128xf32>
    %2 = tpu.matmul %0, %1, %cst {dimension_numbers = #tpu.dot_dimension_numbers<[1], [0], [0], [1], [0, 0, 1, 1], [], []>} : vector<256x128xbf16>, vector<128x128xbf16>, vector<256x128xf32> -> vector<256x128xf32>
    %c0_3 = arith.constant 0 : index
    %c0_4 = arith.constant 0 : index
    %3 = vector.load %arg3[%c0_3, %c0_4] : memref<1x128xf32, #tpu.memory_space<vmem>>, vector<1x128xf32>
    %4 = vector.broadcast %3 : vector<1x128xf32> to vector<256x128xf32>
    %5 = arith.addf %2, %4 : vector<256x128xf32>
    %cst_5 = arith.constant 0.000000e+00 : f32
    %6 = vector.broadcast %cst_5 : f32 to vector<256x128xf32>
    %7 = arith.maximumf %5, %6 : vector<256x128xf32>
    %c0_6 = arith.constant 0 : index
    %c0_7 = arith.constant 0 : index
    %8 = vector.load %arg4[%c0_6, %c0_7] : memref<256x128xf32, #tpu.memory_space<vmem>>, vector<256x128xf32>
    tpu.vector_store %arg4[%c0_6, %c0_7], %7 {strides = array<i32>} : memref<256x128xf32, #tpu.memory_space<vmem>>, vector<256x128xf32>,
    return
  }
  func.func @transform_0(%arg0: i32) -> (i32, i32) {
    %c0_i32 = arith.constant 0 : i32
    %c0_i32_0 = arith.constant 0 : i32
    return %arg0, %c0_i32 : i32, i32
  }
  func.func @transform_1(%arg0: i32) -> (i32, i32) {
    %c0_i32 = arith.constant 0 : i32
    %c0_i32_0 = arith.constant 0 : i32
    %c0_i32_1 = arith.constant 0 : i32
    return %c0_i32, %c0_i32_0 : i32, i32
  }
  func.func @transform_2(%arg0: i32) -> (i32, i32) {
    %c0_i32 = arith.constant 0 : i32
    %c0_i32_0 = arith.constant 0 : i32
    %c0_i32_1 = arith.constant 0 : i32
    return %c0_i32, %c0_i32_0 : i32, i32
  }
  func.func @transform_3(%arg0: i32) -> (i32, i32) {
    %c0_i32 = arith.constant 0 : i32
    %c0_i32_0 = arith.constant 0 : i32
    return %arg0, %c0_i32 : i32, i32
  }
}

</mosaic_0001>

<bundles_post_ra>
// kernel: conv_layer_forward.1
= control target key start
LH: loop header
LB: loop body
LE: loop exit
PB: predicated region body
PF: predicated region fallthrough
CT: control target
= control target key end

     0   :  { %s771_s12 = smov 0   ;;  %s905_s0 = inlined_call_operand.vmem [shape: bf16[512,128], index: 0, kind: input, shape index: {}]   ;;  %s906_s1 = inlined_call_operand.vmem [shape: bf16[128,128], index: 1, kind: input, shape index: {}]   ;;  %s907_s2 = inlined_call_operand.vmem [shape: f32[1,128], index: 2, kind: input, shape index: {}]   ;;  %s908_s3 = inlined_call_operand.vmem [shape: f32[512,128], index: 3, kind: output, shape index: {}]  }
   0x1 LB: > { %s579_s13 = sadd.s32 4294967295, %s749_s12   ;;  %p583_p0 = scmp.ge.s32.totalorder %s749_s12, 1  ;;  %s749_s12 = sphi %s771_s12, %s13_s12  }
   0x2   : > { %p138_p1 = scmp.lt.s32.totalorder %s749_s12, 3 }
   0x4   : > { %p139_p2 = pnand %p583_p0, %p138_p1 }
   0x5   : > { %s584_s22 = sshll.u32 (!%p139_p2), %s579_s13, 5 }
   0x6   : > { %142 = sbr.rel (%p139_p2) target bundleno = 238 (0xee), region = 32  ;;  %p163_p3 = scmp.lt.s32.totalorder (!%p139_p2), %s584_s22, 63 }
   0xb   : > { %v709_v0 = vld [vmem:[%s906_s1 + $0x38] sm:$0xff]  ;;  %v708_v1 = vld [vmem:[%s906_s1 + $0x30] sm:$0xff]  ;;  %v707_v2 = vld [vmem:[%s906_s1 + $0x28] sm:$0xff]  ;;  %s910_s22 = smov (!%p163_p3, %s584_s22), 63 }
   0xc   : > { %370 = vmatpush.bf16.msra.mxu0 %v709_v0  ;;  %710 = vmatpush.bf16.msra.mxu1 %v709_v0  ;;  %v706_v3 = vld [vmem:[%s906_s1 + $0x20] sm:$0xff]  ;;  %v705_v4 = vld [vmem:[%s906_s1 + $0x18] sm:$0xff]  ;;  %v704_v5 = vld [vmem:[%s906_s1 + $0x10] sm:$0xff]  ;;  %s585_s29 = sshll.u32 %s910_s22, 2  ;;  %s587_s10 = sshll.u32 %s910_s22, 3 }
   0xd   : > { %711 = vmatpush.bf16.msra.mxu2 %v709_v0  ;;  %712 = vmatpush.bf16.msra.mxu3 %v709_v0  ;;  %v703_v6 = vld [vmem:[%s906_s1 + $0x8] sm:$0xff]  ;;  %v702_v7 = vld [vmem:[%s906_s1] sm:$0xff]  ;;  %s809_s7 = scalar_lea.vmem %s905_s0, %s585_s29  ;;  %s838_s14 = scalar_lea.vmem %s908_s3, %s587_s10 }
   0xe   : > { %v686_v8 = vld [vmem:[%s809_s7] sm:$0xff]  ;;  %v687_v12 = vld [vmem:[%s809_s7 + $0x8] sm:$0xff]  ;;  %v688_v16 = vld [vmem:[%s809_s7 + $0x10] sm:$0xff] }
   0xf   : > { %v690_v9 = vld [vmem:[%s809_s7 + $0x20] sm:$0xff]  ;;  %v691_v13 = vld [vmem:[%s809_s7 + $0x28] sm:$0xff]  ;;  %v692_v17 = vld [vmem:[%s809_s7 + $0x30] sm:$0xff] }
  0x10   : > { %371 = vmatpush.bf16.msra.mxu0 %v708_v1  ;;  %713 = vmatpush.bf16.msra.mxu1 %v708_v1  ;;  %v694_v10 = vld [vmem:[%s809_s7 + $0x40] sm:$0xff]  ;;  %v695_v14 = vld [vmem:[%s809_s7 + $0x48] sm:$0xff]  ;;  %v696_v18 = vld [vmem:[%s809_s7 + $0x50] sm:$0xff] }
  0x11   : > { %714 = vmatpush.bf16.msra.mxu2 %v708_v1  ;;  %715 = vmatpush.bf16.msra.mxu3 %v708_v1  ;;  %v698_v11 = vld [vmem:[%s809_s7 + $0x60] sm:$0xff]  ;;  %v699_v15 = vld [vmem:[%s809_s7 + $0x68] sm:$0xff]  ;;  %v700_v19 = vld [vmem:[%s809_s7 + $0x70] sm:$0xff] }
  0x12   : > { %v689_v20 = vld [vmem:[%s809_s7 + $0x18] sm:$0xff]  ;;  %v830_v24 = vld [vmem:[%s907_s2] ss:$0 sm:$0xff] }
  0x13   : > { %v693_v21 = vld [vmem:[%s809_s7 + $0x38] sm:$0xff] }
  0x14   : > { %372 = vmatpush.bf16.msra.mxu0 %v707_v2  ;;  %716 = vmatpush.bf16.msra.mxu1 %v707_v2  ;;  %v697_v22 = vld [vmem:[%s809_s7 + $0x58] sm:$0xff] }
  0x15   : > { %717 = vmatpush.bf16.msra.mxu2 %v707_v2  ;;  %718 = vmatpush.bf16.msra.mxu3 %v707_v2  ;;  %v701_v23 = vld [vmem:[%s809_s7 + $0x78] sm:$0xff] }
  0x18   : > { %373 = vmatpush.bf16.msra.mxu0 %v706_v3  ;;  %719 = vmatpush.bf16.msra.mxu1 %v706_v3 }
  0x19   : > { %720 = vmatpush.bf16.msra.mxu2 %v706_v3  ;;  %721 = vmatpush.bf16.msra.mxu3 %v706_v3 }
  0x1c   : > { %374 = vmatpush.bf16.msra.mxu0 %v705_v4  ;;  %722 = vmatpush.bf16.msra.mxu1 %v705_v4 }
  0x1d   : > { %723 = vmatpush.bf16.msra.mxu2 %v705_v4  ;;  %724 = vmatpush.bf16.msra.mxu3 %v705_v4 }
  0x20   : > { %375 = vmatpush.bf16.msra.mxu0 %v704_v5  ;;  %725 = vmatpush.bf16.msra.mxu1 %v704_v5 }
  0x21   : > { %726 = vmatpush.bf16.msra.mxu2 %v704_v5  ;;  %727 = vmatpush.bf16.msra.mxu3 %v704_v5 }
  0x24   : > { %376 = vmatpush.bf16.msra.mxu0 %v703_v6  ;;  %728 = vmatpush.bf16.msra.mxu1 %v703_v6 }
  0x25   : > { %729 = vmatpush.bf16.msra.mxu2 %v703_v6  ;;  %730 = vmatpush.bf16.msra.mxu3 %v703_v6 }
  0x28   : > { %377 = vmatpush.bf16.msra.mxu0 %v702_v7  ;;  %731 = vmatpush.bf16.msra.mxu1 %v702_v7 }
  0x29   : > { %732 = vmatpush.bf16.msra.mxu2 %v702_v7  ;;  %733 = vmatpush.bf16.msra.mxu3 %v702_v7 }
  0x2b   : > { %378 = vmatmul.bf16.vlgmr.msra.gmra.mxu0 %v686_v8  ;;  %398 = vmatmul.bf16.vlgmr.msra.gmra.mxu1 %v690_v9 }
  0x2c   : > { %418 = vmatmul.bf16.vlgmr.msra.gmra.mxu2 %v694_v10  ;;  %438 = vmatmul.bf16.vlgmr.msra.gmra.mxu3 %v698_v11 }
  0x3b   : > { %383 = vmatmul.bf16.gmra.mxu0 %v687_v12  ;;  %403 = vmatmul.bf16.gmra.mxu1 %v691_v13 }
  0x3c   : > { %423 = vmatmul.bf16.gmra.mxu2 %v695_v14  ;;  %443 = vmatmul.bf16.gmra.mxu3 %v699_v15 }
  0x4b   : > { %388 = vmatmul.bf16.gmra.mxu0 %v688_v16  ;;  %408 = vmatmul.bf16.gmra.mxu1 %v692_v17 }
  0x4c   : > { %428 = vmatmul.bf16.gmra.mxu2 %v696_v18  ;;  %448 = vmatmul.bf16.gmra.mxu3 %v700_v19 }
  0x5b   : > { %393 = vmatmul.bf16.gmra.mxu0 %v689_v20  ;;  %413 = vmatmul.bf16.gmra.mxu1 %v693_v21 }
  0x5c   : > { %433 = vmatmul.bf16.gmra.mxu2 %v697_v22  ;;  %453 = vmatmul.bf16.gmra.mxu3 %v701_v23 }
  0xa8   : > { %v379_v25 = vpop.f32.mrf.mxu0  ;;  %v399_v26 = vpop.f32.mrf.mxu1 }
  0xa9   : > { %v380_v27 = vadd.f32 %v830_v24, %v379_v25  ;;  %v400_v28 = vadd.f32 %v830_v24, %v399_v26 }
  0xab   : > { %v459_v29 = vmax.f32 %v380_v27, 0.0  ;;  %v467_v30 = vmax.f32 %v400_v28, 0.0 }
  0xad   : > { %491 = vst [vmem:[%s838_s14] sm:$0xff] %v459_v29 }
  0xae   : > { %499 = vst [vmem:[%s838_s14 + $0x40] sm:$0xff] %v467_v30 }
  0xaf   : > { %v419_v31 = vpop.f32.mrf.mxu2  ;;  %v439_v32 = vpop.f32.mrf.mxu3 }
  0xb0   : > { %v420_v33 = vadd.f32 %v830_v24, %v419_v31  ;;  %v440_v34 = vadd.f32 %v830_v24, %v439_v32  ;;  %v381_v35 = vpop.f32.mrf.mxu0  ;;  %v401_v36 = vpop.f32.mrf.mxu1 }
  0xb1   : > { %v382_v37 = vadd.f32 %v830_v24, %v381_v35  ;;  %v402_v38 = vadd.f32 %v830_v24, %v401_v36 }
  0xb2   : > { %v475_v39 = vmax.f32 %v420_v33, 0.0  ;;  %v483_v40 = vmax.f32 %v440_v34, 0.0 }
  0xb3   : > { %v460_v41 = vmax.f32 %v382_v37, 0.0  ;;  %v468_v42 = vmax.f32 %v402_v38, 0.0 }
  0xb4   : > { %507 = vst [vmem:[%s838_s14 + $0x80] sm:$0xff] %v475_v39 }
  0xb5   : > { %515 = vst [vmem:[%s838_s14 + $0xc0] sm:$0xff] %v483_v40 }
  0xb6   : > { %492 = vst [vmem:[%s838_s14 + $0x8] sm:$0xff] %v460_v41 }
  0xb7   : > { %500 = vst [vmem:[%s838_s14 + $0x48] sm:$0xff] %v468_v42  ;;  %v421_v43 = vpop.f32.mrf.mxu2  ;;  %v441_v44 = vpop.f32.mrf.mxu3 }
  0xb8   : > { %v422_v45 = vadd.f32 %v830_v24, %v421_v43  ;;  %v442_v46 = vadd.f32 %v830_v24, %v441_v44  ;;  %v384_v47 = vpop.f32.mrf.mxu0  ;;  %v404_v48 = vpop.f32.mrf.mxu1 }
  0xb9   : > { %v385_v49 = vadd.f32 %v830_v24, %v384_v47  ;;  %v405_v50 = vadd.f32 %v830_v24, %v404_v48 }
  0xba   : > { %v476_v51 = vmax.f32 %v422_v45, 0.0  ;;  %v484_v52 = vmax.f32 %v442_v46, 0.0 }
  0xbb   : > { %v461_v53 = vmax.f32 %v385_v49, 0.0  ;;  %v469_v54 = vmax.f32 %v405_v50, 0.0 }
  0xbc   : > { %508 = vst [vmem:[%s838_s14 + $0x88] sm:$0xff] %v476_v51 }
  0xbd   : > { %516 = vst [vmem:[%s838_s14 + $0xc8] sm:$0xff] %v484_v52 }
  0xbe   : > { %493 = vst [vmem:[%s838_s14 + $0x10] sm:$0xff] %v461_v53 }
  0xbf   : > { %501 = vst [vmem:[%s838_s14 + $0x50] sm:$0xff] %v469_v54  ;;  %v424_v55 = vpop.f32.mrf.mxu2  ;;  %v444_v56 = vpop.f32.mrf.mxu3 }
  0xc0   : > { %v425_v57 = vadd.f32 %v830_v24, %v424_v55  ;;  %v445_v58 = vadd.f32 %v830_v24, %v444_v56  ;;  %v386_v59 = vpop.f32.mrf.mxu0  ;;  %v406_v60 = vpop.f32.mrf.mxu1 }
  0xc1   : > { %v387_v61 = vadd.f32 %v830_v24, %v386_v59  ;;  %v407_v62 = vadd.f32 %v830_v24, %v406_v60 }
  0xc2   : > { %v477_v63 = vmax.f32 %v425_v57, 0.0  ;;  %v485_v0 = vmax.f32 %v445_v58, 0.0 }
  0xc3   : > { %v462_v1 = vmax.f32 %v387_v61, 0.0  ;;  %v470_v2 = vmax.f32 %v407_v62, 0.0 }
  0xc4   : > { %509 = vst [vmem:[%s838_s14 + $0x90] sm:$0xff] %v477_v63 }
  0xc5   : > { %517 = vst [vmem:[%s838_s14 + $0xd0] sm:$0xff] %v485_v0 }
  0xc6   : > { %494 = vst [vmem:[%s838_s14 + $0x18] sm:$0xff] %v462_v1 }
  0xc7   : > { %502 = vst [vmem:[%s838_s14 + $0x58] sm:$0xff] %v470_v2  ;;  %v426_v3 = vpop.f32.mrf.mxu2  ;;  %v446_v4 = vpop.f32.mrf.mxu3 }
  0xc8   : > { %v427_v5 = vadd.f32 %v830_v24, %v426_v3  ;;  %v447_v6 = vadd.f32 %v830_v24, %v446_v4  ;;  %v389_v7 = vpop.f32.mrf.mxu0  ;;  %v409_v8 = vpop.f32.mrf.mxu1 }
  0xc9   : > { %v390_v9 = vadd.f32 %v830_v24, %v389_v7  ;;  %v410_v10 = vadd.f32 %v830_v24, %v409_v8 }
  0xca   : > { %v478_v11 = vmax.f32 %v427_v5, 0.0  ;;  %v486_v12 = vmax.f32 %v447_v6, 0.0 }
  0xcb   : > { %v463_v13 = vmax.f32 %v390_v9, 0.0  ;;  %v471_v14 = vmax.f32 %v410_v10, 0.0 }
  0xcc   : > { %510 = vst [vmem:[%s838_s14 + $0x98] sm:$0xff] %v478_v11 }
  0xcd   : > { %518 = vst [vmem:[%s838_s14 + $0xd8] sm:$0xff] %v486_v12 }
  0xce   : > { %495 = vst [vmem:[%s838_s14 + $0x20] sm:$0xff] %v463_v13 }
  0xcf   : > { %503 = vst [vmem:[%s838_s14 + $0x60] sm:$0xff] %v471_v14  ;;  %v429_v15 = vpop.f32.mrf.mxu2  ;;  %v449_v16 = vpop.f32.mrf.mxu3 }
  0xd0   : > { %v430_v17 = vadd.f32 %v830_v24, %v429_v15  ;;  %v450_v18 = vadd.f32 %v830_v24, %v449_v16  ;;  %v391_v19 = vpop.f32.mrf.mxu0  ;;  %v411_v20 = vpop.f32.mrf.mxu1 }
  0xd1   : > { %v392_v21 = vadd.f32 %v830_v24, %v391_v19  ;;  %v412_v22 = vadd.f32 %v830_v24, %v411_v20 }
  0xd2   : > { %v479_v23 = vmax.f32 %v430_v17, 0.0  ;;  %v487_v25 = vmax.f32 %v450_v18, 0.0 }
  0xd3   : > { %v464_v26 = vmax.f32 %v392_v21, 0.0  ;;  %v472_v27 = vmax.f32 %v412_v22, 0.0 }
  0xd4   : > { %511 = vst [vmem:[%s838_s14 + $0xa0] sm:$0xff] %v479_v23 }
  0xd5   : > { %519 = vst [vmem:[%s838_s14 + $0xe0] sm:$0xff] %v487_v25 }
  0xd6   : > { %496 = vst [vmem:[%s838_s14 + $0x28] sm:$0xff] %v464_v26 }
  0xd7   : > { %504 = vst [vmem:[%s838_s14 + $0x68] sm:$0xff] %v472_v27  ;;  %v431_v28 = vpop.f32.mrf.mxu2  ;;  %v451_v29 = vpop.f32.mrf.mxu3 }
  0xd8   : > { %v432_v30 = vadd.f32 %v830_v24, %v431_v28  ;;  %v452_v31 = vadd.f32 %v830_v24, %v451_v29  ;;  %v394_v32 = vpop.f32.mrf.mxu0  ;;  %v414_v33 = vpop.f32.mrf.mxu1 }
  0xd9   : > { %v395_v34 = vadd.f32 %v830_v24, %v394_v32  ;;  %v415_v35 = vadd.f32 %v830_v24, %v414_v33 }
  0xda   : > { %v480_v36 = vmax.f32 %v432_v30, 0.0  ;;  %v488_v37 = vmax.f32 %v452_v31, 0.0 }
  0xdb   : > { %v465_v38 = vmax.f32 %v395_v34, 0.0  ;;  %v473_v39 = vmax.f32 %v415_v35, 0.0 }
  0xdc   : > { %512 = vst [vmem:[%s838_s14 + $0xa8] sm:$0xff] %v480_v36 }
  0xdd   : > { %520 = vst [vmem:[%s838_s14 + $0xe8] sm:$0xff] %v488_v37 }
  0xde   : > { %497 = vst [vmem:[%s838_s14 + $0x30] sm:$0xff] %v465_v38 }
  0xdf   : > { %505 = vst [vmem:[%s838_s14 + $0x70] sm:$0xff] %v473_v39  ;;  %v434_v40 = vpop.f32.mrf.mxu2  ;;  %v454_v41 = vpop.f32.mrf.mxu3 }
  0xe0   : > { %v435_v42 = vadd.f32 %v830_v24, %v434_v40  ;;  %v455_v43 = vadd.f32 %v830_v24, %v454_v41  ;;  %v396_v44 = vpop.f32.mrf.mxu0  ;;  %v416_v45 = vpop.f32.mrf.mxu1 }
  0xe1   : > { %v397_v46 = vadd.f32 %v830_v24, %v396_v44  ;;  %v417_v47 = vadd.f32 %v830_v24, %v416_v45 }
  0xe2   : > { %v481_v48 = vmax.f32 %v435_v42, 0.0  ;;  %v489_v49 = vmax.f32 %v455_v43, 0.0 }
  0xe3   : > { %v466_v50 = vmax.f32 %v397_v46, 0.0  ;;  %v474_v51 = vmax.f32 %v417_v47, 0.0 }
  0xe4   : > { %513 = vst [vmem:[%s838_s14 + $0xb0] sm:$0xff] %v481_v48 }
  0xe5   : > { %521 = vst [vmem:[%s838_s14 + $0xf0] sm:$0xff] %v489_v49 }
  0xe6   : > { %498 = vst [vmem:[%s838_s14 + $0x38] sm:$0xff] %v466_v50 }
  0xe7   : > { %506 = vst [vmem:[%s838_s14 + $0x78] sm:$0xff] %v474_v51  ;;  %v436_v52 = vpop.f32.mrf.mxu2  ;;  %v456_v53 = vpop.f32.mrf.mxu3 }
  0xe8   : > { %v437_v54 = vadd.f32 %v830_v24, %v436_v52  ;;  %v457_v55 = vadd.f32 %v830_v24, %v456_v53 }
  0xea   : > { %v482_v56 = vmax.f32 %v437_v54, 0.0  ;;  %v490_v57 = vmax.f32 %v457_v55, 0.0 }
  0xec   : > { %514 = vst [vmem:[%s838_s14 + $0xb8] sm:$0xff] %v482_v56 }
  0xed   : > { %522 = vst [vmem:[%s838_s14 + $0xf8] sm:$0xff] %v490_v57 }
  0xee PF: > { %s13_s12 = sadd.s32 1, %s749_s12  }
  0xef   : > { %p10_p4 = scmp.ge.s32.totalorder %s13_s12, 4  }
  0xf1   :  { %12 = sbr.rel (!%p10_p4) target bundleno = 1 (0x1), region = 62 }

</bundles_post_ra>
